<compile_context>
chip_gen: v5e
topology: v5e:2x2
jax: 0.10.0
libtpu: 0.0.40
codegen_flags: <defaults>
</compile_context>

<pallas_src>
import functools

import jax
import jax.numpy as jnp
from jax.experimental import pallas as pl
from jax.experimental.pallas import tpu as pltpu

_BN_EPS = 1e-5
_ACT_DTYPE = jnp.bfloat16


def _round_up(x, m):
    return ((x + m - 1) // m) * m


# ----------------------------------------------------------------------------
# Pallas kernels
# ----------------------------------------------------------------------------
def _matmul_bn_kernel(*refs, relu, has_identity, multi_k):
    if multi_k:
        *refs, acc_ref = refs
    if has_identity:
        a_ref, w_ref, scale_ref, shift_ref, id_ref, o_ref = refs
    else:
        a_ref, w_ref, scale_ref, shift_ref, o_ref = refs
        id_ref = None

    def epilogue(acc):
        y = acc * scale_ref[...] + shift_ref[...]
        if has_identity:
            y = y + id_ref[...].astype(jnp.float32)
        if relu:
            y = jnp.maximum(y, 0.0)
        o_ref[...] = y.astype(o_ref.dtype)

    if multi_k:
        k = pl.program_id(2)

        @pl.when(k == 0)
        def _():
            acc_ref[...] = jnp.zeros_like(acc_ref)

        acc_ref[...] += jnp.dot(a_ref[...], w_ref[...],
                                preferred_element_type=jnp.float32)

        @pl.when(k == pl.num_programs(2) - 1)
        def _():
            epilogue(acc_ref[...])
    else:
        # Full K in one block: accumulate straight in registers, no scratch.
        epilogue(jnp.dot(a_ref[...], w_ref[...],
                         preferred_element_type=jnp.float32))


def matmul_bn(a, w, scale, shift, *, relu, identity=None,
              out_dtype=_ACT_DTYPE):
    """y = relu?( (a @ w) * scale + shift [+ identity] ).

    a:(M,K) bf16, w:(K,N) bf16, scale/shift:(N,) f32, identity:(M,N) bf16.
    """
    M, K = a.shape
    Kw, N = w.shape
    assert Kw == K

    a = a.astype(jnp.bfloat16)
    w = w.astype(jnp.bfloat16)

    # --- tile selection ------------------------------------------------------
    tm = min(256, _round_up(M, 8))            # shrink tm when M is small
    if N % 256 == 0:
        tn = 256                              # feed the 256-wide MXU (v6e/v7x)
    elif N % 128 == 0:
        tn = 128
    else:
        tn = N                                # full-N block is always legal
    Kp = _round_up(K, 16)                     # bf16 sublane packing (147 -> 160)
    # Full-K block if the double-buffered bf16 A+W tiles fit comfortably.
    if 2 * 2 * Kp * (tm + tn) <= 10 * 1024 * 1024:
        tk = Kp
    else:
        tk = 512
        Kp = _round_up(K, tk)
    Mp = _round_up(M, tm)
    Np = _round_up(N, tn)

    # --- padding to tile multiples (no-op at these shapes, except conv1 K) ---
    if (Mp, Kp) != (M, K):
        a = jnp.pad(a, ((0, Mp - M), (0, Kp - K)))
    if (Kp, Np) != (K, N):
        w = jnp.pad(w, ((0, Kp - K), (0, Np - N)))
    scale_p = jnp.pad(scale.astype(jnp.float32), (0, Np - N)).reshape(1, Np)
    shift_p = jnp.pad(shift.astype(jnp.float32), (0, Np - N)).reshape(1, Np)

    multi_k = (Kp // tk) > 1
    has_identity = identity is not None

    in_specs = [
        pl.BlockSpec((tm, tk), lambda i, j, k: (i, k)),
        pl.BlockSpec((tk, tn), lambda i, j, k: (k, j)),
        pl.BlockSpec((1, tn), lambda i, j, k: (0, j)),
        pl.BlockSpec((1, tn), lambda i, j, k: (0, j)),
    ]
    args = [a, w, scale_p, shift_p]
    if has_identity:
        idp = identity.astype(jnp.bfloat16)
        if (Mp, Np) != (M, N):
            idp = jnp.pad(idp, ((0, Mp - M), (0, Np - N)))
        in_specs.append(pl.BlockSpec((tm, tn), lambda i, j, k: (i, j)))
        args.append(idp)

    out = pl.pallas_call(
        functools.partial(_matmul_bn_kernel, relu=relu,
                          has_identity=has_identity, multi_k=multi_k),
        out_shape=jax.ShapeDtypeStruct((Mp, Np), out_dtype),
        grid_spec=pltpu.PrefetchScalarGridSpec(
            num_scalar_prefetch=0,
            grid=(Mp // tm, Np // tn, Kp // tk),
            in_specs=in_specs,
            out_specs=pl.BlockSpec((tm, tn), lambda i, j, k: (i, j)),
            scratch_shapes=([pltpu.VMEM((tm, tn), jnp.float32)]
                            if multi_k else []),
        ),
        compiler_params=pltpu.CompilerParams(
            dimension_semantics=("parallel", "parallel", "arbitrary"),
            vmem_limit_bytes=32 * 1024 * 1024),
    )(*args)
    if (Mp, Np) != (M, N):
        out = out[:M, :N]
    return out


def _max_window_kernel(p_ref, o_ref):
    # Unrolled pairwise VPU max over the window taps (no XLU reduce).
    m = p_ref[0]
    for t in range(1, p_ref.shape[0]):
        m = jnp.maximum(m, p_ref[t])
    o_ref[...] = m


def max_over_window(patches):
    """max over leading window axis. patches:(KW, M, C) -> (M, C)."""
    KW, M, C = patches.shape
    tm = min(512, _round_up(M, 8))
    Mp = _round_up(M, tm)
    if Mp != M:
        patches = jnp.pad(patches, ((0, 0), (0, Mp - M), (0, 0)))
    out = pl.pallas_call(
        _max_window_kernel,
        out_shape=jax.ShapeDtypeStruct((Mp, C), patches.dtype),
        grid=(Mp // tm,),
        in_specs=[pl.BlockSpec((KW, tm, C), lambda i: (0, i, 0))],
        out_specs=pl.BlockSpec((tm, C), lambda i: (i, 0)),
        compiler_params=pltpu.CompilerParams(
            dimension_semantics=("parallel",)),
    )(patches)
    return out[:M]


def _avgpool_kernel(x_ref, o_ref, *, inv_hw):
    s = jnp.sum(x_ref[...].astype(jnp.float32), axis=1)
    o_ref[...] = s * inv_hw


def global_avg_pool(x):
    """AdaptiveAvgPool2d((1,1)): x:(N, H*W, C) -> (N, C) float32."""
    N, HW, C = x.shape
    if C % 512 == 0:
        tc = 512
    elif C % 128 == 0:
        tc = 128
    else:
        tc = C
    return pl.pallas_call(
        functools.partial(_avgpool_kernel, inv_hw=1.0 / HW),
        out_shape=jax.ShapeDtypeStruct((N, C), jnp.float32),
        grid=(C // tc,),
        in_specs=[pl.BlockSpec((N, HW, tc), lambda c: (0, 0, c))],
        out_specs=pl.BlockSpec((N, tc), lambda c: (0, c)),
        compiler_params=pltpu.CompilerParams(
            dimension_semantics=("parallel",)),
    )(x)


# ----------------------------------------------------------------------------
# Plain-JAX glue: im2col, conv+BN wrapper, ResNet-101 graph
# ----------------------------------------------------------------------------
def _im2col(x, kh, kw, stride, pad):
    """x:(N,H,W,C) -> patches:(N*OH*OW, KH*KW*C); ordering matches the weight
    flattened as (KH, KW, Cin, Cout) -> (KH*KW*Cin, Cout)."""
    N, H, W, C = x.shape
    OH = (H + 2 * pad - kh) // stride + 1
    OW = (W + 2 * pad - kw) // stride + 1
    if pad > 0:
        x = jnp.pad(x, ((0, 0), (pad, pad), (pad, pad), (0, 0)))
    cols = []
    for i in range(kh):
        for j in range(kw):
            cols.append(x[:, i:i + stride * OH:stride,
                          j:j + stride * OW:stride, :])
    patches = jnp.stack(cols, axis=3)            # (N, OH, OW, KH*KW, C)
    return patches.reshape(N * OH * OW, kh * kw * C), OH, OW


def conv_bn(x, p, *, stride, relu, identity=None):
    """Conv2d(bias=False, padding=k//2) + eval-mode BN (+ fused residual/ReLU)."""
    N = x.shape[0]
    kh, kw, cin, cout = p["w"].shape
    if kh == 1 and kw == 1:
        # 1x1 conv needs no im2col: (strided) view + reshape only.
        xs = x if stride == 1 else x[:, ::stride, ::stride, :]
        OH, OW = xs.shape[1], xs.shape[2]
        patches = xs.reshape(N * OH * OW, cin)
    else:
        patches, OH, OW = _im2col(x, kh, kw, stride, kh // 2)
    scale = p["gamma"] / jnp.sqrt(p["var"] + _BN_EPS)
    shift = p["beta"] - p["mean"] * scale
    w2d = p["w"].reshape(kh * kw * cin, cout)
    id2d = None if identity is None else identity.reshape(N * OH * OW, cout)
    y = matmul_bn(patches, w2d, scale, shift, relu=relu, identity=id2d)
    return y.reshape(N, OH, OW, cout)


def max_pool_3x3_s2(x):
    """MaxPool2d(kernel_size=3, stride=2, padding=1) on NHWC."""
    N, H, W, C = x.shape
    OH = (H + 2 - 3) // 2 + 1
    OW = (W + 2 - 3) // 2 + 1
    xp = jnp.pad(x, ((0, 0), (1, 1), (1, 1), (0, 0)),
                 constant_values=-jnp.inf)
    taps = [xp[:, i:i + 2 * OH:2, j:j + 2 * OW:2, :]
            for i in range(3) for j in range(3)]
    patches = jnp.stack(taps, axis=0).reshape(9, N * OH * OW, C)
    out = max_over_window(patches)
    return out.reshape(N, OH, OW, C)


def bottleneck(x, blk, stride):
    out = conv_bn(x, blk["conv1"], stride=1, relu=True)
    out = conv_bn(out, blk["conv2"], stride=stride, relu=True)
    if "down" in blk:
        identity = conv_bn(x, blk["down"], stride=stride, relu=False)
    else:
        identity = x
    # Residual add + ReLU fused into conv3's matmul epilogue.
    return conv_bn(out, blk["conv3"], stride=1, relu=True, identity=identity)


def _make_conv_bn(key, kh, kw, cin, cout):
    k1, k2, k3, k4, k5 = jax.random.split(key, 5)
    fan_in = kh * kw * cin
    w = (jax.random.normal(k1, (kh, kw, cin, cout), jnp.float32)
         * jnp.sqrt(1.0 / fan_in)).astype(_ACT_DTYPE)
    return dict(
        w=w,
        gamma=1.0 + 0.05 * jax.random.normal(k2, (cout,), jnp.float32),
        beta=0.05 * jax.random.normal(k3, (cout,), jnp.float32),
        mean=0.05 * jax.random.normal(k4, (cout,), jnp.float32),
        var=1.0 + 0.05 * jnp.abs(jax.random.normal(k5, (cout,), jnp.float32)),
    )


# ResNet-101: (planes, num_blocks, stride) per stage.
_STAGES = [(64, 3, 1), (128, 4, 2), (256, 23, 2), (512, 3, 2)]


def init_resnet101_params(key):
    keys = iter(jax.random.split(key, 128))
    params = {"conv1": _make_conv_bn(next(keys), 7, 7, 3, 64), "layers": []}
    in_c = 64
    for planes, n_blocks, _ in _STAGES:
        blocks = []
        for b in range(n_blocks):
            blk = {
                "conv1": _make_conv_bn(next(keys), 1, 1, in_c, planes),
                "conv2": _make_conv_bn(next(keys), 3, 3, planes, planes),
                "conv3": _make_conv_bn(next(keys), 1, 1, planes, planes * 4),
            }
            if b == 0:
                blk["down"] = _make_conv_bn(next(keys), 1, 1, in_c, planes * 4)
            blocks.append(blk)
            in_c = planes * 4
        params["layers"].append(blocks)
    return params


def feature_extractor(params, x_nchw, transform_input=False):
    """Forward pass: x (N, 3, H, W) float32 -> 'avgpool' features (N, 2048)."""
    n = x_nchw.shape[0]
    if transform_input:
        x_nchw = jnp.stack(
            [
                x_nchw[:, 0] * (0.229 / 0.5) + (0.485 - 0.5) / 0.5,
                x_nchw[:, 1] * (0.224 / 0.5) + (0.456 - 0.5) / 0.5,
                x_nchw[:, 2] * (0.225 / 0.5) + (0.406 - 0.5) / 0.5,
            ],
            axis=1,
        )
    # NCHW -> NHWC, activations kept in bf16 between layers.
    x = jnp.transpose(x_nchw, (0, 2, 3, 1)).astype(_ACT_DTYPE)

    # stem: conv1 / bn1 / relu / maxpool
    x = conv_bn(x, params["conv1"], stride=2, relu=True)
    x = max_pool_3x3_s2(x)

    # layer1..layer4
    for (planes, n_blocks, stride), blocks in zip(_STAGES, params["layers"]):
        for b, blk in enumerate(blocks):
            x = bottleneck(x, blk, stride if b == 0 else 1)

    # avgpool (FeatureExtractor returns here) then view(n, 2048)
    N, H, W, C = x.shape
    feats = global_avg_pool(x.reshape(N, H * W, C))
    return feats.reshape(n, 2048).astype(jnp.float32)


if __name__ == "__main__":
    key = jax.random.PRNGKey(0)
    pkey, xkey = jax.random.split(key)

    params = init_resnet101_params(pkey)
    # Small-but-consistent input: batch=2, 3 channels, 64x64 spatial
    # (ResNet-101 total stride 32 -> 2x2 spatial before the global avg pool).
    x = jax.random.normal(xkey, (2, 3, 64, 64), jnp.float32)

    feats = feature_extractor(params, x, transform_input=False)
    feats = jax.block_until_ready(feats)

    assert feats.shape == (2, 2048), feats.shape
    assert feats.dtype == jnp.float32
    assert bool(jnp.all(jnp.isfinite(feats)))
    print("KERNEL_OK")
</pallas_src>

<mosaic_0001>
module attributes {stable_mosaic.version = 11 : i64} {
  func.func @_matmul_bn_kernel(%arg0: i32, %arg1: i32, %arg2: i32, %arg3: memref<256x160xbf16, #tpu.memory_space<vmem>>, %arg4: memref<160x64xbf16, #tpu.memory_space<vmem>>, %arg5: memref<1x64xf32, #tpu.memory_space<vmem>>, %arg6: memref<1x64xf32, #tpu.memory_space<vmem>>, %arg7: memref<256x64xbf16, #tpu.memory_space<vmem>>) attributes {dimension_semantics = [#tpu.dimension_semantics<parallel>, #tpu.dimension_semantics<parallel>, #tpu.dimension_semantics<arbitrary>], iteration_bounds = array<i64: 8, 1, 1>, scalar_prefetch = 0 : i64, scratch_operands = 0 : i64, tpu.core_type = #tpu.core_type<tc>, window_params = [{transform_indices = @transform_0, window_bounds = array<i64: 256, 160>}, {transform_indices = @transform_1, window_bounds = array<i64: 160, 64>}, {transform_indices = @transform_2, window_bounds = array<i64: 1, 64>}, {transform_indices = @transform_3, window_bounds = array<i64: 1, 64>}, {transform_indices = @transform_4, window_bounds = array<i64: 256, 64>}]} {
    %c0 = arith.constant 0 : index
    %c0_0 = arith.constant 0 : index
    %0 = vector.load %arg3[%c0, %c0_0] : memref<256x160xbf16, #tpu.memory_space<vmem>>, vector<256x160xbf16>
    %c0_1 = arith.constant 0 : index
    %c0_2 = arith.constant 0 : index
    %1 = vector.load %arg4[%c0_1, %c0_2] : memref<160x64xbf16, #tpu.memory_space<vmem>>, vector<160x64xbf16>
    %cst = arith.constant dense<0.000000e+00> : vector<256x64xf32>
    %2 = tpu.matmul %0, %1, %cst {dimension_numbers = #tpu.dot_dimension_numbers<[1], [0], [0], [1], [0, 0, 1, 1], [], []>} : vector<256x160xbf16>, vector<160x64xbf16>, vector<256x64xf32> -> vector<256x64xf32>
    %c0_3 = arith.constant 0 : index
    %c0_4 = arith.constant 0 : index
    %3 = vector.load %arg5[%c0_3, %c0_4] : memref<1x64xf32, #tpu.memory_space<vmem>>, vector<1x64xf32>
    %4 = vector.broadcast %3 : vector<1x64xf32> to vector<256x64xf32>
    %5 = arith.mulf %2, %4 : vector<256x64xf32>
    %c0_5 = arith.constant 0 : index
    %c0_6 = arith.constant 0 : index
    %6 = vector.load %arg6[%c0_5, %c0_6] : memref<1x64xf32, #tpu.memory_space<vmem>>, vector<1x64xf32>
    %7 = vector.broadcast %6 : vector<1x64xf32> to vector<256x64xf32>
    %8 = arith.addf %5, %7 : vector<256x64xf32>
    %cst_7 = arith.constant 0.000000e+00 : f32
    %9 = vector.broadcast %cst_7 : f32 to vector<256x64xf32>
    %10 = arith.maximumf %8, %9 : vector<256x64xf32>
    %11 = arith.truncf %10 : vector<256x64xf32> to vector<256x64xbf16>
    %c0_8 = arith.constant 0 : index
    %c0_9 = arith.constant 0 : index
    %12 = vector.load %arg7[%c0_8, %c0_9] : memref<256x64xbf16, #tpu.memory_space<vmem>>, vector<256x64xbf16>
    tpu.vector_store %arg7[%c0_8, %c0_9], %11 {strides = array<i32>} : memref<256x64xbf16, #tpu.memory_space<vmem>>, vector<256x64xbf16>,
    return
  }
  func.func @transform_0(%arg0: i32, %arg1: i32, %arg2: i32) -> (i32, i32) {
    %c0_i32 = arith.constant 0 : i32
    return %arg0, %arg2 : i32, i32
  }
  func.func @transform_1(%arg0: i32, %arg1: i32, %arg2: i32) -> (i32, i32) {
    %c0_i32 = arith.constant 0 : i32
    return %arg2, %arg1 : i32, i32
  }
  func.func @transform_2(%arg0: i32, %arg1: i32, %arg2: i32) -> (i32, i32) {
    %c0_i32 = arith.constant 0 : i32
    %c0_i32_0 = arith.constant 0 : i32
    return %c0_i32, %arg1 : i32, i32
  }
  func.func @transform_3(%arg0: i32, %arg1: i32, %arg2: i32) -> (i32, i32) {
    %c0_i32 = arith.constant 0 : i32
    %c0_i32_0 = arith.constant 0 : i32
    return %c0_i32, %arg1 : i32, i32
  }
  func.func @transform_4(%arg0: i32, %arg1: i32, %arg2: i32) -> (i32, i32) {
    %c0_i32 = arith.constant 0 : i32
    return %arg0, %arg1 : i32, i32
  }
}

</mosaic_0001>

<bundles_post_ra>
// kernel: tpu_custom_call.1
= control target key start
LH: loop header
LB: loop body
LE: loop exit
PB: predicated region body
PF: predicated region fallthrough
CT: control target
= control target key end

     0   :  { %s1414_s15 = smov 0   ;;  %s1416_s16 = smov 0   ;;  %s1709_s0 = inlined_call_operand.vmem [shape: bf16[2048,160], index: 0, kind: input, shape index: {}]   ;;  %s1710_s1 = inlined_call_operand.vmem [shape: bf16[160,64], index: 1, kind: input, shape index: {}]   ;;  %s1711_s2 = inlined_call_operand.vmem [shape: f32[1,64], index: 2, kind: input, shape index: {}]   ;;  %s1712_s3 = inlined_call_operand.vmem [shape: f32[1,64], index: 3, kind: input, shape index: {}]   ;;  %s1713_s4 = inlined_call_operand.vmem [shape: bf16[2048,64], index: 4, kind: output, shape index: {}]  }
   0x1   :  { %s1418_s17 = smov 0  }
   0x2 LB: > { %s33_s18 = sadd.s32 1, %s1383_s16  ;;  %p1094_p0 = scmp.ge.s32.totalorder %s1387_s17, 1  ;;  %s1387_s17 = sphi %s1418_s17, %s14_s17   ;;  %s1383_s16 = sphi %s1416_s16, %s1715_s16   ;;  %s1379_s15 = sphi %s1414_s15, %s1714_s15  }
   0x3   : > { %p35_p1 = scmp.ge.s32.totalorder %s33_s18, 8  ;;  %p224_p2 = scmp.lt.s32.totalorder %s1387_s17, 9 }
   0x5   : > { %s1717_s18 = smov (%p35_p1, %s33_s18), 0  ;;  %p225_p3 = pnand %p1094_p0, %p224_p2 }
   0x6   : > { %s1095_s23 = sshll.u32 (!%p225_p3), %s1379_s15, 5 }
   0x7   : > { %228 = sbr.rel (%p225_p3) target bundleno = 308 (0x134), region = 36  ;;  %p274_p4 = scmp.lt.s32.totalorder (!%p225_p3), %s1095_s23, 255 }
   0xc   : > { %v1326_v0 = vld [vmem:[%s1710_s1 + $0x38] sm:$0xff]  ;;  %v1328_v1 = vld [vmem:[%s1710_s1 + $0x48] sm:$0xff]  ;;  %v1325_v2 = vld [vmem:[%s1710_s1 + $0x30] sm:$0xff]  ;;  %s1719_s23 = smov (!%p274_p4, %s1095_s23), 255  ;;  %vm565_vm0 = vcmask 261120   ;;  %vm928_vm1 = vcmask 519168  }
   0xd   : > { %614 = vmatpush.bf16.msra.mxu0 %v1326_v0  ;;  %1329 = vmatpush.bf16.msra.mxu2 %v1326_v0  ;;  %v1327_v3 = vld [vmem:[%s1710_s1 + $0x40] sm:$0xff]  ;;  %s1286_s28 = sshll.u32 %s1719_s23, 3  ;;  %v1324_v4 = vld [vmem:[%s1710_s1 + $0x28] sm:$0xff]  ;;  %v1322_v12 = vld [vmem:[%s1710_s1 + $0x18] sm:$0xff]  ;;  %s1099_s26 = sshll.u32 %s1719_s23, 2 }
   0xe   : > { %709 = vmatpush.bf16.msra.mxu1 %v1328_v1  ;;  %1337 = vmatpush.bf16.msra.mxu3 %v1328_v1  ;;  %s1450_s5 = scalar_lea.vmem %s1709_s0, %s1286_s28  ;;  %v1323_v8 = vld [vmem:[%s1710_s1 + $0x20] sm:$0xff]  ;;  %v1321_v13 = vld [vmem:[%s1710_s1 + $0x10] sm:$0xff]  ;;  %v1320_v17 = vld [vmem:[%s1710_s1 + $0x8] sm:$0xff]  ;;  %s1568_s29 = scalar_lea.vmem %s1713_s4, %s1099_s26 }
   0xf   : > { %v1287_v5 = vld [vmem:[%s1450_s5 + $0x4] sm:$0xf]  ;;  %v1104_v6 = vld [vmem:[%s1450_s5 + $0x8] sm:$0xf0]  ;;  %v1305_v9 = vld [vmem:[%s1450_s5 + $0x94] sm:$0xf] }
  0x10   : > { %v1107_v7 = vor.u32 %v1287_v5, %v1104_v6  ;;  %v1176_v10 = vld [vmem:[%s1450_s5 + $0x98] sm:$0xf0]  ;;  %v1289_v14 = vld [vmem:[%s1450_s5 + $0x14] sm:$0xf]  ;;  %v1307_v18 = vld [vmem:[%s1450_s5 + $0xa4] sm:$0xf] }
  0x11   : > { %615 = vmatpush.bf16.msra.mxu0 %v1325_v2  ;;  %1330 = vmatpush.bf16.msra.mxu2 %v1325_v2  ;;  %v1179_v11 = vor.u32 %v1305_v9, %v1176_v10  ;;  %v1112_v15 = vld [vmem:[%s1450_s5 + $0x18] sm:$0xf0]  ;;  %v1184_v19 = vld [vmem:[%s1450_s5 + $0xa8] sm:$0xf0]  ;;  %v1319_v21 = vld [vmem:[%s1710_s1] sm:$0xff] }
  0x12   : > { %710 = vmatpush.bf16.msra.mxu1 %v1327_v3  ;;  %1338 = vmatpush.bf16.msra.mxu3 %v1327_v3  ;;  %v1115_v16 = vor.u32 %v1289_v14, %v1112_v15  ;;  %v1187_v20 = vor.u32 %v1307_v18, %v1184_v19  ;;  %v1102_v22 = vld [vmem:[%s1450_s5] sm:$0xf]  ;;  %v1288_v23 = vld [vmem:[%s1450_s5 + $0x4] sm:$0xf0]  ;;  %v1291_v28 = vld [vmem:[%s1450_s5 + $0x24] sm:$0xf] }
  0x13   : > { %v1166_v24 = vld [vmem:[%s1450_s5 + $0x80] sm:$0xf]  ;;  %v1304_v25 = vld [vmem:[%s1450_s5 + $0x84] sm:$0xf0]  ;;  %v1103_v26 = vor.u32 %v1288_v23, %v1102_v22  ;;  %v1120_v29 = vld [vmem:[%s1450_s5 + $0x28] sm:$0xf0] }
  0x14   : > { %v1167_v27 = vor.u32 %v1304_v25, %v1166_v24  ;;  %v1123_v30 = vor.u32 %v1291_v28, %v1120_v29  ;;  %v1309_v31 = vld [vmem:[%s1450_s5 + $0xb4] sm:$0xf]  ;;  %v1192_v32 = vld [vmem:[%s1450_s5 + $0xb8] sm:$0xf0]  ;;  %v1110_v34 = vld [vmem:[%s1450_s5 + $0x10] sm:$0xf] }
  0x15   : > { %1268 = vmatmul.msk.bf16.vlgmr.msra.gmra.mxu1 %vm565_vm0, %v1107_v7  ;;  %616 = vmatpush.bf16.msra.mxu0 %v1324_v4  ;;  %v1195_v33 = vor.u32 %v1309_v31, %v1192_v32  ;;  %v1290_v35 = vld [vmem:[%s1450_s5 + $0x14] sm:$0xf0]  ;;  %v1174_v36 = vld [vmem:[%s1450_s5 + $0x90] sm:$0xf]  ;;  %v1293_v40 = vld [vmem:[%s1450_s5 + $0x34] sm:$0xf] }
  0x16   : > { %1331 = vmatpush.bf16.msra.mxu2 %v1324_v4  ;;  %1277 = vmatmul.msk.bf16.vlgmr.msra.gmra.mxu3 %vm565_vm0, %v1179_v11  ;;  %v1306_v37 = vld [vmem:[%s1450_s5 + $0x94] sm:$0xf0]  ;;  %v1111_v38 = vor.u32 %v1290_v35, %v1110_v34  ;;  %v1128_v41 = vld [vmem:[%s1450_s5 + $0x38] sm:$0xf0]  ;;  %v1311_v43 = vld [vmem:[%s1450_s5 + $0xc4] sm:$0xf] }
  0x17   : > { %v1175_v39 = vor.u32 %v1306_v37, %v1174_v36  ;;  %v1131_v42 = vor.u32 %v1293_v40, %v1128_v41  ;;  %v1200_v44 = vld [vmem:[%s1450_s5 + $0xc8] sm:$0xf0]  ;;  %v1118_v46 = vld [vmem:[%s1450_s5 + $0x20] sm:$0xf]  ;;  %v1292_v47 = vld [vmem:[%s1450_s5 + $0x24] sm:$0xf0] }
  0x18   : > { %v1203_v45 = vor.u32 %v1311_v43, %v1200_v44  ;;  %v1182_v48 = vld [vmem:[%s1450_s5 + $0xa0] sm:$0xf]  ;;  %v1308_v49 = vld [vmem:[%s1450_s5 + $0xa4] sm:$0xf0]  ;;  %v1119_v50 = vor.u32 %v1292_v47, %v1118_v46  ;;  %v1295_v52 = vld [vmem:[%s1450_s5 + $0x44] sm:$0xf] }
  0x19   : > { %617 = vmatpush.bf16.msra.mxu0 %v1323_v8  ;;  %v1183_v51 = vor.u32 %v1308_v49, %v1182_v48  ;;  %v1136_v53 = vld [vmem:[%s1450_s5 + $0x48] sm:$0xf0]  ;;  %v1313_v55 = vld [vmem:[%s1450_s5 + $0xd4] sm:$0xf]  ;;  %v1208_v56 = vld [vmem:[%s1450_s5 + $0xd8] sm:$0xf0] }
  0x1a   : > { %1332 = vmatpush.bf16.msra.mxu2 %v1323_v8  ;;  %v1139_v54 = vor.u32 %v1295_v52, %v1136_v53  ;;  %v1211_v57 = vor.u32 %v1313_v55, %v1208_v56  ;;  %v1126_v58 = vld [vmem:[%s1450_s5 + $0x30] sm:$0xf]  ;;  %v1294_v59 = vld [vmem:[%s1450_s5 + $0x34] sm:$0xf0]  ;;  %v1297_v0 = vld [vmem:[%s1450_s5 + $0x54] sm:$0xf] }
  0x1b   : > { %v1190_v60 = vld [vmem:[%s1450_s5 + $0xb0] sm:$0xf]  ;;  %v1310_v61 = vld [vmem:[%s1450_s5 + $0xb4] sm:$0xf0]  ;;  %v1127_v62 = vor.u32 %v1294_v59, %v1126_v58  ;;  %v1144_v1 = vld [vmem:[%s1450_s5 + $0x58] sm:$0xf0] }
  0x1c   : > { %v1191_v63 = vor.u32 %v1310_v61, %v1190_v60  ;;  %v1147_v2 = vor.u32 %v1297_v0, %v1144_v1  ;;  %v1315_v3 = vld [vmem:[%s1450_s5 + $0xe4] sm:$0xf]  ;;  %v1216_v4 = vld [vmem:[%s1450_s5 + $0xe8] sm:$0xf0]  ;;  %v1134_v6 = vld [vmem:[%s1450_s5 + $0x40] sm:$0xf] }
  0x1d   : > { %618 = vmatpush.bf16.msra.mxu0 %v1322_v12  ;;  %v1219_v5 = vor.u32 %v1315_v3, %v1216_v4  ;;  %v1296_v7 = vld [vmem:[%s1450_s5 + $0x44] sm:$0xf0]  ;;  %v1198_v8 = vld [vmem:[%s1450_s5 + $0xc0] sm:$0xf]  ;;  %v1317_v15 = vld [vmem:[%s1450_s5 + $0xf4] sm:$0xf] }
  0x1e   : > { %1333 = vmatpush.bf16.msra.mxu2 %v1322_v12  ;;  %v1312_v9 = vld [vmem:[%s1450_s5 + $0xc4] sm:$0xf0]  ;;  %v1135_v10 = vor.u32 %v1296_v7, %v1134_v6  ;;  %v1299_v12 = vld [vmem:[%s1450_s5 + $0x64] sm:$0xf]  ;;  %v1142_v18 = vld [vmem:[%s1450_s5 + $0x50] sm:$0xf] }
  0x1f   : > { %v1199_v11 = vor.u32 %v1312_v9, %v1198_v8  ;;  %v1298_v19 = vld [vmem:[%s1450_s5 + $0x54] sm:$0xf0]  ;;  %v1301_v24 = vld [vmem:[%s1450_s5 + $0x74] sm:$0xf]  ;;  %v1160_v25 = vld [vmem:[%s1450_s5 + $0x78] sm:$0xf0] }
  0x20   : > { %v1143_v22 = vor.u32 %v1298_v19, %v1142_v18  ;;  %v1300_v28 = vld [vmem:[%s1450_s5 + $0x64] sm:$0xf0]  ;;  %v1214_v29 = vld [vmem:[%s1450_s5 + $0xe0] sm:$0xf]  ;;  %v1168_v34 = vld [vmem:[%s1450_s5 + $0x88] sm:$0xf0] }
  0x21   : > { %619 = vmatpush.bf16.msra.mxu0 %v1321_v13  ;;  %v1158_v37 = vld [vmem:[%s1450_s5 + $0x70] sm:$0xf]  ;;  %v1318_v40 = vld [vmem:[%s1450_s5 + $0xf4] sm:$0xf0]  ;;  %v1553_v46 = vld [vmem:[%s1711_s2] ss:$0 sm:$0xff] }
  0x22   : > { %1334 = vmatpush.bf16.msra.mxu2 %v1321_v13  ;;  %v1152_v13 = vld [vmem:[%s1450_s5 + $0x68] sm:$0xf0]  ;;  %v1558_v49 = vld [vmem:[%s1712_s3] ss:$0 sm:$0xff] }
  0x23   : > { %v1155_v14 = vor.u32 %v1299_v12, %v1152_v13 }
  0x25   : > { %1269 = vmatmul.msk.bf16.gmra.mxu1 %vm565_vm0, %v1115_v16  ;;  %620 = vmatpush.bf16.msra.mxu0 %v1320_v17  ;;  %v1224_v16 = vld [vmem:[%s1450_s5 + $0xf8] sm:$0xf0] }
  0x26   : > { %1335 = vmatpush.bf16.msra.mxu2 %v1320_v17  ;;  %1278 = vmatmul.msk.bf16.gmra.mxu3 %vm565_vm0, %v1187_v20  ;;  %v1227_v17 = vor.u32 %v1317_v15, %v1224_v16  ;;  %v1206_v20 = vld [vmem:[%s1450_s5 + $0xd0] sm:$0xf] }
  0x29   : > { %621 = vmatpush.bf16.msra.mxu0 %v1319_v21 }
  0x2a   : > { %1336 = vmatpush.bf16.msra.mxu2 %v1319_v21  ;;  %v1314_v21 = vld [vmem:[%s1450_s5 + $0xd4] sm:$0xf0] }
  0x2b   : > { %v1207_v23 = vor.u32 %v1314_v21, %v1206_v20 }
  0x2c   : > { %622 = vmatmul.bf16.vlgmr.msra.gmra.mxu0 %v1103_v26  ;;  %v1163_v26 = vor.u32 %v1301_v24, %v1160_v25 }
  0x2d   : > { %662 = vmatmul.bf16.vlgmr.msra.gmra.mxu2 %v1167_v27  ;;  %v1150_v27 = vld [vmem:[%s1450_s5 + $0x60] sm:$0xf] }
  0x2e   : > { %v1151_v31 = vor.u32 %v1300_v28, %v1150_v27 }
  0x35   : > { %1270 = vmatmul.msk.bf16.gmra.mxu1 %vm565_vm0, %v1123_v30  ;;  %v1316_v30 = vld [vmem:[%s1450_s5 + $0xe4] sm:$0xf0] }
  0x36   : > { %1279 = vmatmul.msk.bf16.gmra.mxu3 %vm565_vm0, %v1195_v33  ;;  %v1215_v32 = vor.u32 %v1316_v30, %v1214_v29  ;;  %v1303_v33 = vld [vmem:[%s1450_s5 + $0x84] sm:$0xf] }
  0x37   : > { %v1171_v35 = vor.u32 %v1303_v33, %v1168_v34 }
  0x3c   : > { %627 = vmatmul.bf16.gmra.mxu0 %v1111_v38  ;;  %v1302_v38 = vld [vmem:[%s1450_s5 + $0x74] sm:$0xf0] }
  0x3d   : > { %667 = vmatmul.bf16.gmra.mxu2 %v1175_v39  ;;  %v1222_v39 = vld [vmem:[%s1450_s5 + $0xf0] sm:$0xf]  ;;  %v1159_v41 = vor.u32 %v1302_v38, %v1158_v37 }
  0x45   : > { %1271 = vmatmul.msk.bf16.gmra.mxu1 %vm565_vm0, %v1131_v42  ;;  %v1223_v42 = vor.u32 %v1318_v40, %v1222_v39 }
  0x46   : > { %1280 = vmatmul.msk.bf16.gmra.mxu3 %vm565_vm0, %v1203_v45 }
  0x4c   : > { %632 = vmatmul.bf16.gmra.mxu0 %v1119_v50 }
  0x4d   : > { %672 = vmatmul.bf16.gmra.mxu2 %v1183_v51 }
  0x55   : > { %1272 = vmatmul.msk.bf16.gmra.mxu1 %vm565_vm0, %v1139_v54 }
  0x56   : > { %1281 = vmatmul.msk.bf16.gmra.mxu3 %vm565_vm0, %v1211_v57 }
  0x5c   : > { %637 = vmatmul.bf16.gmra.mxu0 %v1127_v62 }
  0x5d   : > { %677 = vmatmul.bf16.gmra.mxu2 %v1191_v63 }
  0x65   : > { %1273 = vmatmul.msk.bf16.gmra.mxu1 %vm565_vm0, %v1147_v2 }
  0x66   : > { %1282 = vmatmul.msk.bf16.gmra.mxu3 %vm565_vm0, %v1219_v5 }
  0x6c   : > { %642 = vmatmul.bf16.gmra.mxu0 %v1135_v10 }
  0x6d   : > { %682 = vmatmul.bf16.gmra.mxu2 %v1199_v11 }
  0x75   : > { %1274 = vmatmul.msk.bf16.gmra.mxu1 %vm565_vm0, %v1155_v14 }
  0x76   : > { %1283 = vmatmul.msk.bf16.gmra.mxu3 %vm565_vm0, %v1227_v17 }
  0x7c   : > { %647 = vmatmul.bf16.gmra.mxu0 %v1143_v22 }
  0x7d   : > { %687 = vmatmul.bf16.gmra.mxu2 %v1207_v23 }
  0x85   : > { %1275 = vmatmul.msk.bf16.gmra.mxu1 %vm565_vm0, %v1163_v26 }
  0x8c   : > { %652 = vmatmul.bf16.gmra.mxu0 %v1151_v31 }
  0x8d   : > { %692 = vmatmul.bf16.gmra.mxu2 %v1215_v32 }
  0x92   : > { %v712_v36 = vpop.f32.mrf.mxu1 }
  0x95   : > { %1276 = vmatmul.msk.bf16.gmra.mxu1 %vm565_vm0, %v1171_v35 }
  0x99   : > { %v757_v45 = vpop.f32.mrf.mxu3 }
  0x9a   : > { %v714_v43 = vpop.f32.mrf.mxu1 }
  0x9c   : > { %657 = vmatmul.bf16.gmra.mxu0 %v1159_v41 }
  0x9d   : > { %697 = vmatmul.bf16.gmra.mxu2 %v1223_v42 }
  0xa1   : > { %v759_v55 = vpop.f32.mrf.mxu3 }
  0xa2   : > { %v717_v44 = vpop.f32.mrf.mxu1 }
  0xa9   : > { %v623_v47 = vpop.f32.mrf.mxu0  ;;  %v762_v4 = vpop.f32.mrf.mxu3 }
  0xaa   : > { %v713_v48 = vadd.f32 %v712_v36, %v623_v47  ;;  %v719_v50 = vpop.f32.mrf.mxu1 }
  0xac   : > { %v796_v51 = vmul.f32 %v1553_v46, %v713_v48 }
  0xae   : > { %v832_v52 = vadd.f32 %v1558_v49, %v796_v51 }
  0xb0   : > { %v864_v53 = vmax.f32 %v832_v52, 0.0  ;;  %v1563_v54 = vpop.f32.mrf.mxu2 }
  0xb1   : > { %v625_v56 = vpop.f32.mrf.mxu0  ;;  %v764_v16 = vpop.f32.mrf.mxu3 }
  0xb2   : > { %v896_v57 = vpack.c.bf16 %v864_v53, %v864_v53  ;;  %v715_v58 = vadd.f32 %v714_v43, %v625_v56  ;;  %v722_v59 = vpop.f32.mrf.mxu1 }
  0xb4   : > { %929 = vst.msk [vmem:[%s1568_s29] sm:$0xf] %vm928_vm1, %v896_v57  ;;  %v797_v60 = vmul.f32 %v1553_v46, %v715_v58 }
  0xb6   : > { %v833_v61 = vadd.f32 %v1558_v49, %v797_v60 }
  0xb8   : > { %v865_v62 = vmax.f32 %v833_v61, 0.0  ;;  %v1574_v63 = vpop.f32.mrf.mxu2 }
  0xb9   : > { %v628_v0 = vpop.f32.mrf.mxu0  ;;  %v767_v32 = vpop.f32.mrf.mxu3 }
  0xba   : > { %v897_v1 = vpack.c.bf16 %v865_v62, %v865_v62  ;;  %v718_v2 = vadd.f32 %v717_v44, %v628_v0  ;;  %v724_v3 = vpop.f32.mrf.mxu1 }
  0xbc   : > { %930 = vst.msk [vmem:[%s1568_s29 + $0x4] sm:$0xf] %vm928_vm1, %v897_v1  ;;  %v798_v5 = vmul.f32 %v1553_v46, %v718_v2 }
  0xbe   : > { %v834_v6 = vadd.f32 %v1558_v49, %v798_v5 }
  0xc0   : > { %v866_v7 = vmax.f32 %v834_v6, 0.0  ;;  %v668_v8 = vpop.f32.mrf.mxu2 }
  0xc1   : > { %v758_v9 = vadd.f32 %v757_v45, %v668_v8  ;;  %v630_v10 = vpop.f32.mrf.mxu0  ;;  %v769_v51 = vpop.f32.mrf.mxu3 }
  0xc2   : > { %v898_v11 = vpack.c.bf16 %v866_v7, %v866_v7  ;;  %v720_v12 = vadd.f32 %v719_v50, %v630_v10  ;;  %v727_v13 = vpop.f32.mrf.mxu1 }
  0xc3   : > { %v814_v14 = vmul.f32 %v1553_v46, %v758_v9 }
  0xc4   : > { %931 = vst.msk [vmem:[%s1568_s29 + $0x8] sm:$0xf] %vm928_vm1, %v898_v11  ;;  %v799_v15 = vmul.f32 %v1553_v46, %v720_v12 }
  0xc5   : > { %v850_v17 = vadd.f32 %v1558_v49, %v814_v14 }
  0xc6   : > { %v835_v18 = vadd.f32 %v1558_v49, %v799_v15 }
  0xc7   : > { %v882_v19 = vmax.f32 %v850_v17, 0.0 }
  0xc8   : > { %v867_v20 = vmax.f32 %v835_v18, 0.0  ;;  %v670_v21 = vpop.f32.mrf.mxu2 }
  0xc9   : > { %v914_v22 = vpack.c.bf16 %v882_v19, %v882_v19  ;;  %v760_v23 = vadd.f32 %v759_v55, %v670_v21  ;;  %v633_v24 = vpop.f32.mrf.mxu0  ;;  %v772_v9 = vpop.f32.mrf.mxu3 }
  0xca   : > { %v899_v25 = vpack.c.bf16 %v867_v20, %v867_v20  ;;  %v723_v26 = vadd.f32 %v722_v59, %v633_v24  ;;  %v729_v27 = vpop.f32.mrf.mxu1 }
  0xcb   : > { %947 = vst.msk [vmem:[%s1568_s29 + $0x48] sm:$0xf] %vm928_vm1, %v914_v22  ;;  %v815_v28 = vmul.f32 %v1553_v46, %v760_v23 }
  0xcc   : > { %932 = vst.msk [vmem:[%s1568_s29 + $0xc] sm:$0xf] %vm928_vm1, %v899_v25  ;;  %v800_v29 = vmul.f32 %v1553_v46, %v723_v26 }
  0xcd   : > { %v851_v30 = vadd.f32 %v1558_v49, %v815_v28 }
  0xce   : > { %v836_v31 = vadd.f32 %v1558_v49, %v800_v29 }
  0xcf   : > { %v883_v33 = vmax.f32 %v851_v30, 0.0 }
  0xd0   : > { %v868_v34 = vmax.f32 %v836_v31, 0.0  ;;  %v673_v35 = vpop.f32.mrf.mxu2 }
  0xd1   : > { %v915_v36 = vpack.c.bf16 %v883_v33, %v883_v33  ;;  %v763_v37 = vadd.f32 %v762_v4, %v673_v35  ;;  %v635_v38 = vpop.f32.mrf.mxu0  ;;  %v774_v25 = vpop.f32.mrf.mxu3 }
  0xd2   : > { %v900_v39 = vpack.c.bf16 %v868_v34, %v868_v34  ;;  %v725_v40 = vadd.f32 %v724_v3, %v635_v38  ;;  %v732_v41 = vpop.f32.mrf.mxu1 }
  0xd3   : > { %948 = vst.msk [vmem:[%s1568_s29 + $0x4c] sm:$0xf] %vm928_vm1, %v915_v36  ;;  %v816_v42 = vmul.f32 %v1553_v46, %v763_v37 }
  0xd4   : > { %933 = vst.msk [vmem:[%s1568_s29 + $0x10] sm:$0xf] %vm928_vm1, %v900_v39  ;;  %v801_v43 = vmul.f32 %v1553_v46, %v725_v40 }
  0xd5   : > { %v852_v44 = vadd.f32 %v1558_v49, %v816_v42 }
  0xd6   : > { %v837_v45 = vadd.f32 %v1558_v49, %v801_v43 }
  0xd7   : > { %v884_v47 = vmax.f32 %v852_v44, 0.0 }
  0xd8   : > { %v869_v48 = vmax.f32 %v837_v45, 0.0  ;;  %v675_v50 = vpop.f32.mrf.mxu2 }
  0xd9   : > { %v916_v52 = vpack.c.bf16 %v884_v47, %v884_v47  ;;  %v765_v53 = vadd.f32 %v764_v16, %v675_v50  ;;  %v638_v55 = vpop.f32.mrf.mxu0 }
  0xda   : > { %v901_v56 = vpack.c.bf16 %v869_v48, %v869_v48  ;;  %v728_v57 = vadd.f32 %v727_v13, %v638_v55  ;;  %v734_v58 = vpop.f32.mrf.mxu1 }
  0xdb   : > { %949 = vst.msk [vmem:[%s1568_s29 + $0x50] sm:$0xf] %vm928_vm1, %v916_v52  ;;  %v817_v59 = vmul.f32 %v1553_v46, %v765_v53 }
  0xdc   : > { %934 = vst.msk [vmem:[%s1568_s29 + $0x14] sm:$0xf] %vm928_vm1, %v901_v56  ;;  %v802_v60 = vmul.f32 %v1553_v46, %v728_v57 }
  0xdd   : > { %v853_v61 = vadd.f32 %v1558_v49, %v817_v59 }
  0xde   : > { %v838_v62 = vadd.f32 %v1558_v49, %v802_v60 }
  0xdf   : > { %v885_v0 = vmax.f32 %v853_v61, 0.0 }
  0xe0   : > { %v870_v1 = vmax.f32 %v838_v62, 0.0  ;;  %v678_v2 = vpop.f32.mrf.mxu2 }
  0xe1   : > { %v917_v3 = vpack.c.bf16 %v885_v0, %v885_v0  ;;  %v768_v4 = vadd.f32 %v767_v32, %v678_v2  ;;  %v640_v5 = vpop.f32.mrf.mxu0 }
  0xe2   : > { %v902_v6 = vpack.c.bf16 %v870_v1, %v870_v1  ;;  %v730_v7 = vadd.f32 %v729_v27, %v640_v5  ;;  %v737_v8 = vpop.f32.mrf.mxu1 }
  0xe3   : > { %950 = vst.msk [vmem:[%s1568_s29 + $0x54] sm:$0xf] %vm928_vm1, %v917_v3  ;;  %v818_v10 = vmul.f32 %v1553_v46, %v768_v4 }
  0xe4   : > { %935 = vst.msk [vmem:[%s1568_s29 + $0x18] sm:$0xf] %vm928_vm1, %v902_v6  ;;  %v803_v11 = vmul.f32 %v1553_v46, %v730_v7 }
  0xe5   : > { %v854_v12 = vadd.f32 %v1558_v49, %v818_v10 }
  0xe6   : > { %v839_v13 = vadd.f32 %v1558_v49, %v803_v11 }
  0xe7   : > { %v886_v14 = vmax.f32 %v854_v12, 0.0 }
  0xe8   : > { %v871_v15 = vmax.f32 %v839_v13, 0.0  ;;  %v680_v16 = vpop.f32.mrf.mxu2 }
  0xe9   : > { %v918_v17 = vpack.c.bf16 %v886_v14, %v886_v14  ;;  %v770_v18 = vadd.f32 %v769_v51, %v680_v16  ;;  %v643_v19 = vpop.f32.mrf.mxu0 }
  0xea   : > { %v903_v20 = vpack.c.bf16 %v871_v15, %v871_v15  ;;  %v733_v21 = vadd.f32 %v732_v41, %v643_v19  ;;  %v739_v22 = vpop.f32.mrf.mxu1  ;;  %v777_v41 = vpop.f32.mrf.mxu3 }
  0xeb   : > { %951 = vst.msk [vmem:[%s1568_s29 + $0x58] sm:$0xf] %vm928_vm1, %v918_v17  ;;  %v819_v23 = vmul.f32 %v1553_v46, %v770_v18 }
  0xec   : > { %936 = vst.msk [vmem:[%s1568_s29 + $0x1c] sm:$0xf] %vm928_vm1, %v903_v20  ;;  %v804_v24 = vmul.f32 %v1553_v46, %v733_v21 }
  0xed   : > { %v855_v26 = vadd.f32 %v1558_v49, %v819_v23 }
  0xee   : > { %v840_v27 = vadd.f32 %v1558_v49, %v804_v24 }
  0xef   : > { %v887_v28 = vmax.f32 %v855_v26, 0.0 }
  0xf0   : > { %v872_v29 = vmax.f32 %v840_v27, 0.0  ;;  %v683_v30 = vpop.f32.mrf.mxu2 }
  0xf1   : > { %v919_v31 = vpack.c.bf16 %v887_v28, %v887_v28  ;;  %v773_v32 = vadd.f32 %v772_v9, %v683_v30  ;;  %v645_v33 = vpop.f32.mrf.mxu0 }
  0xf2   : > { %v904_v34 = vpack.c.bf16 %v872_v29, %v872_v29  ;;  %v735_v35 = vadd.f32 %v734_v58, %v645_v33  ;;  %v742_v36 = vpop.f32.mrf.mxu1  ;;  %v779_v61 = vpop.f32.mrf.mxu3 }
  0xf3   : > { %952 = vst.msk [vmem:[%s1568_s29 + $0x5c] sm:$0xf] %vm928_vm1, %v919_v31  ;;  %v820_v37 = vmul.f32 %v1553_v46, %v773_v32 }
  0xf4   : > { %937 = vst.msk [vmem:[%s1568_s29 + $0x20] sm:$0xf] %vm928_vm1, %v904_v34  ;;  %v805_v38 = vmul.f32 %v1553_v46, %v735_v35 }
  0xf5   : > { %v856_v39 = vadd.f32 %v1558_v49, %v820_v37 }
  0xf6   : > { %v841_v40 = vadd.f32 %v1558_v49, %v805_v38 }
  0xf7   : > { %v888_v42 = vmax.f32 %v856_v39, 0.0 }
  0xf8   : > { %v873_v43 = vmax.f32 %v841_v40, 0.0  ;;  %v685_v44 = vpop.f32.mrf.mxu2 }
  0xf9   : > { %v920_v45 = vpack.c.bf16 %v888_v42, %v888_v42  ;;  %v775_v47 = vadd.f32 %v774_v25, %v685_v44  ;;  %v648_v48 = vpop.f32.mrf.mxu0 }
  0xfa   : > { %v905_v50 = vpack.c.bf16 %v873_v43, %v873_v43  ;;  %v738_v51 = vadd.f32 %v737_v8, %v648_v48  ;;  %v744_v52 = vpop.f32.mrf.mxu1  ;;  %v782_v16 = vpop.f32.mrf.mxu3 }
  0xfb   : > { %953 = vst.msk [vmem:[%s1568_s29 + $0x60] sm:$0xf] %vm928_vm1, %v920_v45  ;;  %v821_v53 = vmul.f32 %v1553_v46, %v775_v47 }
  0xfc   : > { %938 = vst.msk [vmem:[%s1568_s29 + $0x24] sm:$0xf] %vm928_vm1, %v905_v50  ;;  %v806_v55 = vmul.f32 %v1553_v46, %v738_v51 }
  0xfd   : > { %v857_v56 = vadd.f32 %v1558_v49, %v821_v53 }
  0xfe   : > { %v842_v57 = vadd.f32 %v1558_v49, %v806_v55 }
  0xff   : > { %v889_v58 = vmax.f32 %v857_v56, 0.0 }
 0x100   : > { %v874_v59 = vmax.f32 %v842_v57, 0.0  ;;  %v688_v60 = vpop.f32.mrf.mxu2 }
 0x101   : > { %v921_v62 = vpack.c.bf16 %v889_v58, %v889_v58  ;;  %v778_v0 = vadd.f32 %v777_v41, %v688_v60  ;;  %v650_v1 = vpop.f32.mrf.mxu0 }
 0x102   : > { %v906_v2 = vpack.c.bf16 %v874_v59, %v874_v59  ;;  %v740_v3 = vadd.f32 %v739_v22, %v650_v1  ;;  %v747_v4 = vpop.f32.mrf.mxu1  ;;  %v784_v34 = vpop.f32.mrf.mxu3 }
 0x103   : > { %954 = vst.msk [vmem:[%s1568_s29 + $0x64] sm:$0xf] %vm928_vm1, %v921_v62  ;;  %v822_v5 = vmul.f32 %v1553_v46, %v778_v0 }
 0x104   : > { %939 = vst.msk [vmem:[%s1568_s29 + $0x28] sm:$0xf] %vm928_vm1, %v906_v2  ;;  %v807_v6 = vmul.f32 %v1553_v46, %v740_v3 }
 0x105   : > { %v858_v7 = vadd.f32 %v1558_v49, %v822_v5 }
 0x106   : > { %v843_v8 = vadd.f32 %v1558_v49, %v807_v6 }
 0x107   : > { %v890_v9 = vmax.f32 %v858_v7, 0.0 }
 0x108   : > { %v875_v10 = vmax.f32 %v843_v8, 0.0  ;;  %v690_v11 = vpop.f32.mrf.mxu2 }
 0x109   : > { %v922_v12 = vpack.c.bf16 %v890_v9, %v890_v9  ;;  %v780_v13 = vadd.f32 %v779_v61, %v690_v11  ;;  %v653_v14 = vpop.f32.mrf.mxu0 }
 0x10a   : > { %v907_v15 = vpack.c.bf16 %v875_v10, %v875_v10  ;;  %v743_v17 = vadd.f32 %v742_v36, %v653_v14  ;;  %v749_v18 = vpop.f32.mrf.mxu1  ;;  %v787_v58 = vpop.f32.mrf.mxu3 }
 0x10b   : > { %955 = vst.msk [vmem:[%s1568_s29 + $0x68] sm:$0xf] %vm928_vm1, %v922_v12  ;;  %v823_v19 = vmul.f32 %v1553_v46, %v780_v13 }
 0x10c   : > { %940 = vst.msk [vmem:[%s1568_s29 + $0x2c] sm:$0xf] %vm928_vm1, %v907_v15  ;;  %v808_v20 = vmul.f32 %v1553_v46, %v743_v17 }
 0x10d   : > { %v859_v21 = vadd.f32 %v1558_v49, %v823_v19 }
 0x10e   : > { %v844_v22 = vadd.f32 %v1558_v49, %v808_v20 }
 0x10f   : > { %v891_v23 = vmax.f32 %v859_v21, 0.0 }
 0x110   : > { %v876_v24 = vmax.f32 %v844_v22, 0.0  ;;  %v693_v25 = vpop.f32.mrf.mxu2 }
 0x111   : > { %v923_v26 = vpack.c.bf16 %v891_v23, %v891_v23  ;;  %v783_v27 = vadd.f32 %v782_v16, %v693_v25  ;;  %v655_v28 = vpop.f32.mrf.mxu0 }
 0x112   : > { %v908_v29 = vpack.c.bf16 %v876_v24, %v876_v24  ;;  %v745_v30 = vadd.f32 %v744_v52, %v655_v28  ;;  %v752_v31 = vpop.f32.mrf.mxu1  ;;  %v789_v12 = vpop.f32.mrf.mxu3 }
 0x113   : > { %956 = vst.msk [vmem:[%s1568_s29 + $0x6c] sm:$0xf] %vm928_vm1, %v923_v26  ;;  %v824_v32 = vmul.f32 %v1553_v46, %v783_v27  ;;  %v753_v33 = vadd.f32 %v752_v31, %v1563_v54 }
 0x114   : > { %941 = vst.msk [vmem:[%s1568_s29 + $0x30] sm:$0xf] %vm928_vm1, %v908_v29  ;;  %v809_v35 = vmul.f32 %v1553_v46, %v745_v30 }
 0x115   : > { %v860_v36 = vadd.f32 %v1558_v49, %v824_v32  ;;  %v812_v37 = vmul.f32 %v1553_v46, %v753_v33 }
 0x116   : > { %v845_v38 = vadd.f32 %v1558_v49, %v809_v35 }
 0x117   : > { %v892_v39 = vmax.f32 %v860_v36, 0.0  ;;  %v848_v40 = vadd.f32 %v1558_v49, %v812_v37 }
 0x118   : > { %v877_v41 = vmax.f32 %v845_v38, 0.0  ;;  %v695_v42 = vpop.f32.mrf.mxu2 }
 0x119   : > { %v924_v54 = vpack.c.bf16 %v892_v39, %v892_v39  ;;  %v880_v43 = vmax.f32 %v848_v40, 0.0  ;;  %v785_v44 = vadd.f32 %v784_v34, %v695_v42  ;;  %v658_v45 = vpop.f32.mrf.mxu0 }
 0x11a   : > { %v909_v47 = vpack.c.bf16 %v877_v41, %v877_v41  ;;  %v748_v48 = vadd.f32 %v747_v4, %v658_v45  ;;  %v754_v50 = vpop.f32.mrf.mxu1 }
 0x11b   : > { %957 = vst.msk [vmem:[%s1568_s29 + $0x70] sm:$0xf] %vm928_vm1, %v924_v54  ;;  %v912_v51 = vpack.c.bf16 %v880_v43, %v880_v43  ;;  %v825_v52 = vmul.f32 %v1553_v46, %v785_v44  ;;  %v755_v53 = vadd.f32 %v754_v50, %v1574_v63 }
 0x11c   : > { %942 = vst.msk [vmem:[%s1568_s29 + $0x34] sm:$0xf] %vm928_vm1, %v909_v47  ;;  %v810_v55 = vmul.f32 %v1553_v46, %v748_v48 }
 0x11d   : > { %945 = vst.msk [vmem:[%s1568_s29 + $0x40] sm:$0xf] %vm928_vm1, %v912_v51  ;;  %v861_v56 = vadd.f32 %v1558_v49, %v825_v52  ;;  %v813_v57 = vmul.f32 %v1553_v46, %v755_v53 }
 0x11e   : > { %v846_v59 = vadd.f32 %v1558_v49, %v810_v55 }
 0x11f   : > { %v893_v60 = vmax.f32 %v861_v56, 0.0  ;;  %v849_v61 = vadd.f32 %v1558_v49, %v813_v57 }
 0x120   : > { %v878_v63 = vmax.f32 %v846_v59, 0.0  ;;  %v698_v62 = vpop.f32.mrf.mxu2 }
 0x121   : > { %v925_v0 = vpack.c.bf16 %v893_v60, %v893_v60  ;;  %v881_v1 = vmax.f32 %v849_v61, 0.0  ;;  %v788_v2 = vadd.f32 %v787_v58, %v698_v62  ;;  %v660_v3 = vpop.f32.mrf.mxu0 }
 0x122   : > { %v910_v4 = vpack.c.bf16 %v878_v63, %v878_v63  ;;  %v750_v5 = vadd.f32 %v749_v18, %v660_v3 }
 0x123   : > { %958 = vst.msk [vmem:[%s1568_s29 + $0x74] sm:$0xf] %vm928_vm1, %v925_v0  ;;  %v913_v6 = vpack.c.bf16 %v881_v1, %v881_v1  ;;  %v826_v7 = vmul.f32 %v1553_v46, %v788_v2 }
 0x124   : > { %943 = vst.msk [vmem:[%s1568_s29 + $0x38] sm:$0xf] %vm928_vm1, %v910_v4  ;;  %v811_v8 = vmul.f32 %v1553_v46, %v750_v5 }
 0x125   : > { %946 = vst.msk [vmem:[%s1568_s29 + $0x44] sm:$0xf] %vm928_vm1, %v913_v6  ;;  %v862_v9 = vadd.f32 %v1558_v49, %v826_v7 }
 0x126   : > { %v847_v10 = vadd.f32 %v1558_v49, %v811_v8 }
 0x127   : > { %v894_v11 = vmax.f32 %v862_v9, 0.0 }
 0x128   : > { %v879_v13 = vmax.f32 %v847_v10, 0.0  ;;  %v700_v14 = vpop.f32.mrf.mxu2 }
 0x129   : > { %v926_v15 = vpack.c.bf16 %v894_v11, %v894_v11  ;;  %v790_v16 = vadd.f32 %v789_v12, %v700_v14 }
 0x12a   : > { %v911_v17 = vpack.c.bf16 %v879_v13, %v879_v13 }
 0x12b   : > { %959 = vst.msk [vmem:[%s1568_s29 + $0x78] sm:$0xf] %vm928_vm1, %v926_v15  ;;  %v827_v18 = vmul.f32 %v1553_v46, %v790_v16 }
 0x12c   : > { %944 = vst.msk [vmem:[%s1568_s29 + $0x3c] sm:$0xf] %vm928_vm1, %v911_v17 }
 0x12d   : > { %v863_v19 = vadd.f32 %v1558_v49, %v827_v18 }
 0x12f   : > { %v895_v20 = vmax.f32 %v863_v19, 0.0 }
 0x131   : > { %v927_v21 = vpack.c.bf16 %v895_v20, %v895_v20 }
 0x133   : > { %960 = vst.msk [vmem:[%s1568_s29 + $0x7c] sm:$0xf] %vm928_vm1, %v927_v21 }
 0x134 PF: > { %s14_s17 = sadd.s32 1, %s1387_s17   ;;  %s1714_s15 = smov %s1383_s16 }
 0x135   : > { %p11_p5 = scmp.ge.s32.totalorder %s14_s17, 10   ;;  %s1715_s16 = smov %s1717_s18 }
 0x137   :  { %13 = sbr.rel (!%p11_p5) target bundleno = 2 (0x2), region = 75 }

</bundles_post_ra>
